<compile_context>
chip_gen: v7x
topology: tpu7x:2x2x1
jax: 0.10.0
libtpu: 0.0.40
codegen_flags: <defaults>
</compile_context>

<pallas_src>
import jax
import jax.numpy as jnp
from jax.experimental import pallas as pl
from jax.experimental.pallas import tpu as pltpu


def _focal_modulation(one_minus_pt, gamma):
    """(1 - pt) ** gamma without float pow when gamma is a small integer."""
    g = float(gamma)
    if g == 0.0:
        return jnp.ones_like(one_minus_pt)
    if g.is_integer() and 1.0 <= g <= 8.0:
        acc = one_minus_pt
        for _ in range(int(g) - 1):
            acc = acc * one_minus_pt
        return acc
    # General float gamma: caller clamps one_minus_pt >= 0, so the log inside
    # pow never sees a negative value.
    return one_minus_pt ** g


def _make_focal_loss_kernel(gamma, n_total, block_rows):
    def kernel(logits_ref, targets_ref, alpha_ref, out_ref):
        i = pl.program_id(0)

        @pl.when(i == 0)
        def _init():
            out_ref[0, 0] = 0.0

        logits = logits_ref[...].astype(jnp.float32)        # (TM, C)
        tgt = targets_ref[...]                              # (TM, 1) int32
        alpha = alpha_ref[...].astype(jnp.float32)          # (1, C)
        tm, c = logits.shape

        # Numerically stable log-sum-exp over the class (lane) axis.
        m = jnp.max(logits, axis=-1, keepdims=True)                      # (TM, 1)
        lse = m + jnp.log(jnp.sum(jnp.exp(logits - m),
                                  axis=-1, keepdims=True))               # (TM, 1)

        # One-hot gather of the target logit / per-class alpha (TPU friendly:
        # masked lane reduction instead of a real gather).
        cls_idx = jax.lax.broadcasted_iota(jnp.int32, (tm, c), 1)
        onehot = cls_idx == tgt                                          # (TM, C)
        target_logit = jnp.sum(jnp.where(onehot, logits, 0.0),
                               axis=-1, keepdims=True)                   # (TM, 1)
        alpha_t = jnp.sum(jnp.where(onehot, alpha, 0.0),
                          axis=-1, keepdims=True)                        # (TM, 1)

        ce = lse - target_logit                    # -log p_t
        pt = jnp.exp(target_logit - lse)           # p_t (reuses the same diff)
        one_minus_pt = jnp.maximum(1.0 - pt, 0.0)  # clamp NaN hazard when pt ~ 1+eps
        loss = alpha_t * _focal_modulation(one_minus_pt, gamma) * ce     # (TM, 1)

        # Mask padded rows of the ragged last tile (their block contents are
        # undefined); jnp.where also squashes any NaN/inf they produced.
        row_ids = i * block_rows + jax.lax.broadcasted_iota(jnp.int32, (tm, 1), 0)
        loss = jnp.where(row_ids < n_total, loss, 0.0)

        out_ref[0, 0] += jnp.sum(loss)

        @pl.when(i == pl.num_programs(0) - 1)
        def _finalize():
            out_ref[0, 0] = out_ref[0, 0] / n_total

    return kernel


def focal_loss(inputs, targets, alpha=None, gamma=2.0, block_rows=None):
    """Pallas TPU implementation of FocalLoss.forward.

    inputs:  (N, C) float logits (any float dtype; upcast to f32 in-kernel)
    targets: (N,)   integer class indices
    alpha:   optional (C,) per-class weights
    """
    n, c = inputs.shape

    if alpha is None:
        alpha_arr = jnp.ones((1, c), dtype=jnp.float32)
    else:
        alpha_arr = jnp.asarray(alpha, dtype=jnp.float32).reshape(1, c)
    targets_2d = targets.astype(jnp.int32).reshape(n, 1)

    if block_rows is None:
        itemsize = jnp.dtype(inputs.dtype).itemsize
        # ~2 MiB per logits block; with double buffering this stays well under
        # the default scoped-VMEM limit on v5e/v6e and within v7x's 64 MiB.
        target_bytes = 2 * 1024 * 1024
        block_rows = max(8, min(4096, target_bytes // max(1, c * itemsize)))
    block_rows = min(block_rows, n)
    if block_rows < n:
        block_rows = max(8, (block_rows // 8) * 8)   # sublane alignment
    grid = (pl.cdiv(n, block_rows),)

    kernel = _make_focal_loss_kernel(gamma, n, block_rows)
    out = pl.pallas_call(
        kernel,
        out_shape=jax.ShapeDtypeStruct((1, 1), jnp.float32),
        grid=grid,
        in_specs=[
            pl.BlockSpec((block_rows, c), lambda i: (i, 0)),   # logits tile
            pl.BlockSpec((block_rows, 1), lambda i: (i, 0)),   # targets tile
            pl.BlockSpec((1, c), lambda i: (0, 0)),            # alpha (resident)
        ],
        out_specs=pl.BlockSpec(memory_space=pltpu.SMEM),       # scalar accumulator
        compiler_params=pltpu.CompilerParams(
            dimension_semantics=("arbitrary",),                # reduction axis
        ),
    )(inputs, targets_2d, alpha_arr)
    return out[0, 0]


def _focal_loss_ref(inputs, targets, alpha=None, gamma=2.0):
    """Plain-JAX reference mirroring the PyTorch module."""
    logits = inputs.astype(jnp.float32)
    lse = jax.nn.logsumexp(logits, axis=-1)
    ce = lse - jnp.take_along_axis(logits, targets[:, None], axis=-1)[:, 0]
    pt = jnp.exp(-ce)
    loss = (1.0 - pt) ** gamma * ce
    if alpha is not None:
        loss = jnp.asarray(alpha, jnp.float32)[targets] * loss
    return jnp.mean(loss)


if __name__ == "__main__":
    key = jax.random.PRNGKey(0)
    k_logits, k_targets = jax.random.split(key)

    # Small seizure-prediction style problem; N chosen so the grid has several
    # tiles and a ragged last tile (block_rows=8 -> tiles of 8, 8, 4 rows).
    N, C = 20, 4
    logits = jax.random.normal(k_logits, (N, C), dtype=jnp.float32)
    targets = jax.random.randint(k_targets, (N,), 0, C, dtype=jnp.int32)
    alpha = jnp.array([0.25, 0.75, 0.5, 1.0], dtype=jnp.float32)
    gamma = 2.0

    out = focal_loss(logits, targets, alpha=alpha, gamma=gamma, block_rows=8)
    out = jax.block_until_ready(out)

    ref = _focal_loss_ref(logits, targets, alpha=alpha, gamma=gamma)
    assert jnp.allclose(out, ref, atol=1e-5, rtol=1e-5), (out, ref)

    # Also check the no-alpha path (pure focal cross entropy).
    out2 = jax.block_until_ready(focal_loss(logits, targets, gamma=gamma, block_rows=8))
    ref2 = _focal_loss_ref(logits, targets, gamma=gamma)
    assert jnp.allclose(out2, ref2, atol=1e-5, rtol=1e-5), (out2, ref2)

    print("KERNEL_OK")
</pallas_src>

<mosaic_0001>
module attributes {stable_mosaic.version = 11 : i64} {
  func.func @kernel(%arg0: i32, %arg1: memref<8x4xf32, #tpu.memory_space<vmem>>, %arg2: memref<8x1xi32, #tpu.memory_space<vmem>>, %arg3: memref<1x4xf32, #tpu.memory_space<vmem>>, %arg4: memref<1x1xf32, #tpu.memory_space<smem>>) attributes {dimension_semantics = [#tpu.dimension_semantics<arbitrary>], iteration_bounds = array<i64: 3>, scalar_prefetch = 0 : i64, scratch_operands = 0 : i64, tpu.core_type = #tpu.core_type<tc>, window_params = [{transform_indices = @transform_0, window_bounds = array<i64: 8, 4>}, {transform_indices = @transform_1, window_bounds = array<i64: 8, 1>}, {pipeline_mode = #tpu.pipeline_mode<synchronous>, transform_indices = @transform_2, window_bounds = array<i64: 1, 4>}, {transform_indices = @transform_3, window_bounds = array<i64: 1, 1>}]} {
    %c0_i32 = arith.constant 0 : i32
    %0 = arith.cmpi eq, %arg0, %c0_i32 : i32
    %1 = arith.extui %0 : i1 to i32
    %c0_i32_0 = arith.constant 0 : i32
    %2 = arith.cmpi ne, %1, %c0_i32_0 : i32
    scf.if %2 {
      %cst_20 = arith.constant 0.000000e+00 : f32
      %c0_21 = arith.constant 0 : index
      %c0_22 = arith.constant 0 : index
      %56 = memref.load %arg4[%c0_21, %c0_22] : memref<1x1xf32, #tpu.memory_space<smem>>
      memref.store %cst_20, %arg4[%c0_21, %c0_22] : memref<1x1xf32, #tpu.memory_space<smem>>
    } else {
    }
    %c0 = arith.constant 0 : index
    %c0_1 = arith.constant 0 : index
    %3 = vector.load %arg1[%c0, %c0_1] : memref<8x4xf32, #tpu.memory_space<vmem>>, vector<8x4xf32>
    %c0_2 = arith.constant 0 : index
    %c0_3 = arith.constant 0 : index
    %4 = vector.load %arg2[%c0_2, %c0_3] : memref<8x1xi32, #tpu.memory_space<vmem>>, vector<8x1xi32>
    %c0_4 = arith.constant 0 : index
    %c0_5 = arith.constant 0 : index
    %5 = vector.load %arg3[%c0_4, %c0_5] : memref<1x4xf32, #tpu.memory_space<vmem>>, vector<1x4xf32>
    %cst = arith.constant dense<0xFF800000> : vector<8xf32>
    %6 = vector.multi_reduction <maximumf>, %3, %cst [1] : vector<8x4xf32> to vector<8xf32>
    %7 = vector.shape_cast %6 : vector<8xf32> to vector<8x1xf32>
    %8 = vector.broadcast %7 : vector<8x1xf32> to vector<8x4xf32>
    %9 = arith.subf %3, %8 : vector<8x4xf32>
    %10 = math.exp %9 : vector<8x4xf32>
    %cst_6 = arith.constant dense<0.000000e+00> : vector<8xf32>
    %11 = vector.multi_reduction <add>, %10, %cst_6 [1] : vector<8x4xf32> to vector<8xf32>
    %12 = vector.shape_cast %11 : vector<8xf32> to vector<8x1xf32>
    %13 = math.log %12 : vector<8x1xf32>
    %14 = arith.addf %7, %13 : vector<8x1xf32>
    %15 = tpu.iota {dimensions = array<i32: 1>} : vector<8x4xi32>
    %16 = vector.broadcast %4 : vector<8x1xi32> to vector<8x4xi32>
    %17 = arith.cmpi eq, %15, %16 : vector<8x4xi32>
    %cst_7 = arith.constant 0.000000e+00 : f32
    %18 = vector.broadcast %cst_7 : f32 to vector<8x4xf32>
    %19 = arith.select %17, %3, %18 : vector<8x4xi1>, vector<8x4xf32>
    %cst_8 = arith.constant dense<0.000000e+00> : vector<8xf32>
    %20 = vector.multi_reduction <add>, %19, %cst_8 [1] : vector<8x4xf32> to vector<8xf32>
    %21 = vector.shape_cast %20 : vector<8xf32> to vector<8x1xf32>
    %cst_9 = arith.constant 0.000000e+00 : f32
    %22 = vector.shape_cast %5 : vector<1x4xf32> to vector<1x4xf32>
    %23 = vector.broadcast %22 : vector<1x4xf32> to vector<8x4xf32>
    %24 = vector.broadcast %cst_9 : f32 to vector<8x4xf32>
    %25 = arith.select %17, %23, %24 : vector<8x4xi1>, vector<8x4xf32>
    %cst_10 = arith.constant dense<0.000000e+00> : vector<8xf32>
    %26 = vector.multi_reduction <add>, %25, %cst_10 [1] : vector<8x4xf32> to vector<8xf32>
    %27 = vector.shape_cast %26 : vector<8xf32> to vector<8x1xf32>
    %28 = arith.subf %14, %21 : vector<8x1xf32>
    %29 = arith.subf %21, %14 : vector<8x1xf32>
    %30 = math.exp %29 : vector<8x1xf32>
    %cst_11 = arith.constant 1.000000e+00 : f32
    %31 = vector.broadcast %cst_11 : f32 to vector<8x1xf32>
    %32 = arith.subf %31, %30 : vector<8x1xf32>
    %cst_12 = arith.constant 0.000000e+00 : f32
    %33 = vector.broadcast %cst_12 : f32 to vector<8x1xf32>
    %34 = arith.maximumf %32, %33 : vector<8x1xf32>
    %35 = arith.mulf %34, %34 : vector<8x1xf32>
    %36 = arith.mulf %27, %35 : vector<8x1xf32>
    %37 = arith.mulf %36, %28 : vector<8x1xf32>
    %c8_i32 = arith.constant 8 : i32
    %38 = arith.muli %arg0, %c8_i32 : i32
    %39 = tpu.iota {dimensions = array<i32: 0>} : vector<8x1xi32>
    %40 = vector.broadcast %38 : i32 to vector<8x1xi32>
    %41 = arith.addi %40, %39 : vector<8x1xi32>
    %c20_i32 = arith.constant 20 : i32
    %42 = vector.broadcast %c20_i32 : i32 to vector<8x1xi32>
    %43 = arith.cmpi slt, %41, %42 : vector<8x1xi32>
    %cst_13 = arith.constant 0.000000e+00 : f32
    %44 = vector.broadcast %cst_13 : f32 to vector<8x1xf32>
    %45 = arith.select %43, %37, %44 : vector<8x1xi1>, vector<8x1xf32>
    %c0_14 = arith.constant 0 : index
    %c0_15 = arith.constant 0 : index
    %46 = memref.load %arg4[%c0_14, %c0_15] : memref<1x1xf32, #tpu.memory_space<smem>>
    %47 = vector.shape_cast %45 : vector<8x1xf32> to vector<1x8x1xf32>
    %cst_16 = arith.constant dense<0.000000e+00> : vector<1xf32>
    %48 = vector.multi_reduction <add>, %47, %cst_16 [1, 2] : vector<1x8x1xf32> to vector<1xf32>
    %49 = vector.shape_cast %48 : vector<1xf32> to vector<1x1x1xf32>
    %50 = vector.extract %49[0, 0, 0] : f32 from vector<1x1x1xf32>
    %51 = arith.addf %46, %50 : f32
    %c0_17 = arith.constant 0 : index
    %c0_18 = arith.constant 0 : index
    %52 = memref.load %arg4[%c0_17, %c0_18] : memref<1x1xf32, #tpu.memory_space<smem>>
    memref.store %51, %arg4[%c0_17, %c0_18] : memref<1x1xf32, #tpu.memory_space<smem>>
    %c2_i32 = arith.constant 2 : i32
    %53 = arith.cmpi eq, %arg0, %c2_i32 : i32
    %54 = arith.extui %53 : i1 to i32
    %c0_i32_19 = arith.constant 0 : i32
    %55 = arith.cmpi ne, %54, %c0_i32_19 : i32
    scf.if %55 {
      %c0_20 = arith.constant 0 : index
      %c0_21 = arith.constant 0 : index
      %56 = memref.load %arg4[%c0_20, %c0_21] : memref<1x1xf32, #tpu.memory_space<smem>>
      %cst_22 = arith.constant 2.000000e+01 : f32
      %57 = arith.divf %56, %cst_22 : f32
      %c0_23 = arith.constant 0 : index
      %c0_24 = arith.constant 0 : index
      %58 = memref.load %arg4[%c0_23, %c0_24] : memref<1x1xf32, #tpu.memory_space<smem>>
      memref.store %57, %arg4[%c0_23, %c0_24] : memref<1x1xf32, #tpu.memory_space<smem>>
    } else {
    }
    return
  }
  func.func @transform_0(%arg0: i32) -> (i32, i32) {
    %c0_i32 = arith.constant 0 : i32
    %c0_i32_0 = arith.constant 0 : i32
    return %arg0, %c0_i32 : i32, i32
  }
  func.func @transform_1(%arg0: i32) -> (i32, i32) {
    %c0_i32 = arith.constant 0 : i32
    %c0_i32_0 = arith.constant 0 : i32
    return %arg0, %c0_i32 : i32, i32
  }
  func.func @transform_2(%arg0: i32) -> (i32, i32) {
    %c0_i32 = arith.constant 0 : i32
    %c0_i32_0 = arith.constant 0 : i32
    %c0_i32_1 = arith.constant 0 : i32
    return %c0_i32, %c0_i32_0 : i32, i32
  }
  func.func @transform_3(%arg0: i32) -> (i32, i32) {
    %c0_i32 = arith.constant 0 : i32
    %c0_i32_0 = arith.constant 0 : i32
    %c0_i32_1 = arith.constant 0 : i32
    return %c0_i32, %c0_i32_0 : i32, i32
  }
}

</mosaic_0001>

<bundles_post_ra>
// kernel: tpu_custom_call.1
= control target key start
LH: loop header
LB: loop body
LE: loop exit
PB: predicated region body
PF: predicated region fallthrough
CT: control target
= control target key end

     0   :  { %8 = vsyncpa [#allocation3], 0  ;;  %s403_s12 = smov 0   ;;  %s456_s0 = inlined_call_operand.vmem [shape: f32[20,4], index: 0, kind: input, shape index: {}]   ;;  %s457_s1 = inlined_call_operand.vmem [shape: s32[20,1], index: 1, kind: input, shape index: {}]   ;;  %s458_s2 = inlined_call_operand.vmem [shape: f32[1,4], index: 2, kind: input, shape index: {}]   ;;  %s459_s3 = inlined_call_operand.hbm [shape: f32[1,1], index: 3, kind: output, shape index: {}]  }
   0x1 LB: > { %s409_s13 = sadd.s32 4294967295, %s378_s12   ;;  %p313_p0 = scmp.ge.s32.totalorder %s378_s12, 1  ;;  %s378_s12 = sphi %s403_s12, %s14_s12  }
   0x2   : > { %p141_p1 = scmp.lt.s32.totalorder %s378_s12, 4 }
   0x4   : > { %p142_p2 = pnand %p313_p0, %p141_p1 }
   0x5   : > { %p163_p3 = scmp.lt.s32.totalorder (!%p142_p2), %s409_s13, 2  ;;  %v380_v0 = vmov (!%p142_p2), 0   ;;  %vm180_vm0 = vcmask (!%p142_p2), 31744   ;;  %v193_v7 = vlaneseq (!%p142_p2)  ;;  %v317_v13 = vld [vmem:[%s458_s2] ss:$0 sm:$0xff] (!%p142_p2)  ;;  %s318_s24 = sshll.u32 (!%p142_p2), %s409_s13, 3 }
   0x6   : > { %145 = sbr.rel (%p142_p2) target bundleno = 576 (0x240), region = 32  ;;  %349 = vset.pattern.permute.xlu0 (!%p142_p2), %v380_v0  ;;  %v225_v27 = vstv (!%p142_p2), %s318_s24  ;;  %vm230_vm3 = vcmask (!%p142_p2), 7168   ;;  %p334_p4 = scmp.eq.s32.totalorder (!%p142_p2), %s409_s13, 0 }
   0x7   : > { %v194_v8 = vand.u32 (!%p142_p2), 127, %v193_v7  ;;  %v224_v25 = vshrl.u32 (!%p142_p2), %v193_v7, 7  ;;  %s381_s25 = smov (!%p142_p2), 0.0   ;;  %p335_p5 = scmp.eq.s32.totalorder (!%p142_p2), %s409_s13, 2 }
   0x8   : > { %s356_s5 = scalar_lea.hbm (!%p142_p2), %s459_s3, 16 }
   0x9   : > { %v226_v29 = vadd.s32 (!%p142_p2), %v225_v27, %v224_v25  ;;  %p357_p6 = scmp.ne.s32.totalorder (!%p142_p2), %s459_s3, %s356_s5  ;;  %p362_p9 = scmp.lt.u32.totalorder (!%p142_p2), %s356_s5, %s459_s3 }
   0xb   : > { %vm227_vm2 = vcmp.lt.s32.totalorder (!%p142_p2), %v226_v29, 20  ;;  %p358_p7 = pnand (!%p142_p2), %p357_p6, %p335_p5 }
   0xd   : > { %s164_s14 = scalar_select %p163_p3, %s409_s13, 2 }
   0xe   : > { %327 = sst [smem:[#allocation2]] (%p334_p4), %s381_s25  ;;  %p359_p8 = pneg %p358_p7 }
   0xf   : > { %s314_s15 = sshll.u32 %s164_s14, 3  ;;  %s229_s26 = sld [smem:[#allocation2]] }
  0x10   : > { %s166_s18 = scalar_lea.vmem %s456_s0, %s314_s15  ;;  %s170_s21 = scalar_lea.vmem %s457_s1, %s314_s15 }
  0x11   : > { %v177_v1 = vld [vmem:[%s166_s18] sm:$0xff]  ;;  %p364_p10 = pnand %p362_p9, %p359_p8 }
  0x12   : > { %v181_v2 = vsel %vm180_vm0, %v177_v1, -inf  ;;  %v178_v3 = vld [vmem:[%s170_s21] sm:$0xff] }
  0x13   : > { %182 = vmax.xlane.f32.xlu0 %v181_v2 }
  0x29   : > { %196 = vperm.xlu0 %349, %v178_v3  }
  0xa0   : > { %v183_v4 = vpop.xlane.xlu0 %182 }
  0xa1   : > { %v184_v5 = vsub.f32 %v177_v1, %v183_v4 }
  0xa3   : > { %v185_v6 = vmul.f32 1.442695, %v184_v5 }
  0xa5   : > { %350 = vpow2.f32 %v185_v6 }
  0xa8   : > { %v197_v9 = vpop.permute.xlu0 %196 }
  0xa9   : > { %vm198_vm1 = vcmp.eq.s32.totalorder %v194_v8, %v197_v9 }
  0xaa   : > { %v199_v11 = vsel %vm198_vm1, %v177_v1, 0.0  ;;  %v209_v15 = vsel %vm198_vm1, %v317_v13, 0.0 }
  0xab   : > { %v200_v14 = vsel %vm180_vm0, %v199_v11, 0.0  ;;  %v210_v16 = vsel %vm180_vm0, %v209_v15, 0.0 }
  0xaf   : > { %v351_v10 = vpop.eup %350 }
  0xb0   : > { %v187_v12 = vsel %vm180_vm0, %v351_v10, 0.0 }
  0xb1   : > { %188 = vadd.xlane.f32.xlu1 %v187_v12 }
  0xb5   : > { %201 = vadd.xlane.f32.xlu1 %v200_v14 }
  0xb9   : > { %211 = vadd.xlane.f32.xlu1 %v210_v16 }
 0x13e   : > { %v189_v17 = vpop.xlane.xlu1 %188 }
 0x13f   : > { %352 = vlog2.f32 %v189_v17 }
 0x142   : > { %v202_v21 = vpop.xlane.xlu1 %201 }
 0x146   : > { %v212_v31 = vpop.xlane.xlu1 %211 }
 0x149   : > { %v353_v18 = vpop.eup %352 }
 0x14a   : > { %v191_v19 = vmul.f32 0.6931472, %v353_v18 }
 0x14c   : > { %v192_v20 = vadd.f32 %v191_v19, %v183_v4 }
 0x14e   : > { %v214_v22 = vsub.f32 %v202_v21, %v192_v20  ;;  %v213_v32 = vsub.f32 %v192_v20, %v202_v21 }
 0x150   : > { %v215_v23 = vmul.f32 1.442695, %v214_v22 }
 0x152   : > { %354 = vpow2.f32 %v215_v23 }
 0x15c   : > { %v355_v24 = vpop.eup %354 }
 0x15d   : > { %v217_v26 = vsub.f32 1.0, %v355_v24 }
 0x15f   : > { %v218_v28 = vmax.f32 %v217_v26, 0.0 }
 0x161   : > { %v219_v30 = vmul.f32 %v218_v28, %v218_v28 }
 0x163   : > { %v220_v33 = vmul.f32 %v219_v30, %v212_v31 }
 0x165   : > { %v221_v34 = vmul.f32 %v220_v33, %v213_v32 }
 0x167   : > { %v228_v35 = vsel %vm227_vm2, %v221_v34, 0.0 }
 0x168   : > { %v231_v36 = vsel %vm230_vm3, %v228_v35, 0.0 }
 0x169   : > { %232 = vadd.xlane.f32.xlu1 %v231_v36 }
 0x1f6   : > { %v233_v37 = vpop.xlane.xlu1 %232 }
 0x1f7   : > { %v234_v38 = vrot.slane %v233_v37, 4 }
 0x1f9   : > { %v235_v39 = vadd.f32 %v234_v38, %v233_v37 }
 0x1fb   : > { %v236_v40 = vrot.slane %v235_v39, 2 }
 0x1fd   : > { %v237_v41 = vadd.f32 %v236_v40, %v235_v39 }
 0x1ff   : > { %v238_v42 = vrot.slane %v237_v41, 1 }
 0x201   : > { %v239_v43 = vadd.f32 %v238_v42, %v237_v41 }
 0x203   : > { %324 = vpush %v239_v43 }
 0x234   : > { %s325_s27 = spop %324 }
 0x235   : > { %s241_s28 = sadd.f32 %s325_s27, %s229_s26 }
 0x237   : > { %243 = sst [smem:[#allocation2]] %s241_s28  ;;  %s251_s29 = smul.f32 0.05, %s241_s28 }
 0x239   : > { %329 = sst [smem:[#allocation2]] (%p335_p5), %s251_s29 }
 0x23a   : > { %367 = shalt.err (!%p364_p10)
}
 0x23b   : > { %s382_s10 = smov [#allocation2]  }
 0x23c   : > { %331 = dma.smem_to_hbm (%p335_p5), %s382_s10, 16, %s459_s3, [#allocation3]  }
 0x23d   : > { %373 = dma.done.wait (%p335_p5), [#allocation3], 16  }
 0x23e   : > { %375 = vsyncadd (%p335_p5), [#allocation3], 4294967280 }
 0x23f   : > { %266 = sfence }
 0x240 PF: > { %s14_s12 = sadd.s32 1, %s378_s12  }
 0x241   : > { %p11_p11 = scmp.ge.s32.totalorder %s14_s12, 5  }
 0x243   :  { %13 = sbr.rel (!%p11_p11) target bundleno = 1 (0x1), region = 72 }
 0x24a   :  { %272 = vsyncpa [#allocation3], 1 }
 0x24b   :  { %274 = vsyncpa [#allocation3 + $0x1], 1 }

</bundles_post_ra>
